<compile_context>
chip_gen: v5e
topology: v5e:2x2
jax: 0.10.0
libtpu: 0.0.40
codegen_flags: <defaults>
</compile_context>

<pallas_src>
import functools

import jax
import jax.numpy as jnp
import numpy as np
from jax import lax
from jax.experimental import pallas as pl
from jax.experimental.pallas import tpu as pltpu


def _round_up(x, m):
    return ((x + m - 1) // m) * m


# ---------------------------------------------------------------------------
# Kernel 1: AR(1) recurrence over T on a lane-dense flattened B*L*(K-1) axis.
#   u[0] = scale * noise[0]
#   u[t] = rho * u[t-1] + noise[t]       (t >= 1)
# `noise` already contains the cholesky contraction (one batched einsum in the
# wrapper), so nothing sits on the MXU inside the serial dependency chain.
# ---------------------------------------------------------------------------
def ar1_kernel(rho_ref, scale_ref, noise_ref, u_ref):
    T = noise_ref.shape[0]
    rho = rho_ref[...]                                        # (1, tile)
    u_prev = scale_ref[...] * noise_ref[pl.ds(0, 1), :]       # (1, tile)
    u_ref[pl.ds(0, 1), :] = u_prev
    # T is a small static constant: fully unroll so the per-step FMAs and the
    # per-row stores interleave (LLO scheduler sees the whole chain).
    for t in range(1, T):
        u_prev = rho * u_prev + noise_ref[pl.ds(t, 1), :]
        u_ref[pl.ds(t, 1), :] = u_prev


def compute_random_effects(raw_rho, raw_chol, eps, *, B, L, T, Km1):
    assert L == Km1, (
        "HierarchicalMultinomialRegression implicitly requires L == K-1 "
        f"(got L={L}, K-1={Km1})")

    hi = lax.Precision.HIGHEST
    rho = jnp.tanh(raw_rho)                                    # (L, Km1)
    scale = lax.rsqrt(1.0 - rho * rho)                         # (L, Km1)
    chol_diag = jnp.diagonal(raw_chol, axis1=1, axis2=2).T     # (L, Km1) = chol[k,l,l]
    C = jnp.sum(raw_chol, axis=1)                              # (Km1, L) = sum_i chol[k,i,j]

    # noise[:,:,0,:] = chol[k,l,l] * eps[:,:,0,:]              ('KLL,BLK->BLK')
    # noise[:,:,t,:] = eps[:,:,t,:] @ C   (t >= 1)             ('kij,blk->blj')
    noise0 = (chol_diag[None, :, :] * eps[:, :, 0, :])[:, :, None, :]          # (B,L,1,Km1)
    noise_rest = jnp.einsum("bltk,kj->bltj", eps[:, :, 1:, :], C, precision=hi)
    noise = jnp.concatenate([noise0, noise_rest], axis=2)                       # (B,L,T,Km1)

    # Time-major, lane-dense flattened layout: (T, B*L*Km1)
    BLF = B * L * Km1
    noise_tm = jnp.transpose(noise, (2, 0, 1, 3)).reshape(T, BLF)
    rho_flat = jnp.broadcast_to(rho.reshape(1, L * Km1), (B, L * Km1)).reshape(1, BLF)
    scale_flat = jnp.broadcast_to(scale.reshape(1, L * Km1), (B, L * Km1)).reshape(1, BLF)

    tile_bl = min(2048, _round_up(BLF, 128))
    BLF_pad = _round_up(BLF, tile_bl)
    pad = BLF_pad - BLF
    noise_p = jnp.pad(noise_tm, ((0, 0), (0, pad)))
    rho_p = jnp.pad(rho_flat, ((0, 0), (0, pad)))
    scale_p = jnp.pad(scale_flat, ((0, 0), (0, pad)))

    u_tm = pl.pallas_call(
        ar1_kernel,
        out_shape=jax.ShapeDtypeStruct((T, BLF_pad), jnp.float32),
        grid=(BLF_pad // tile_bl,),
        in_specs=[
            pl.BlockSpec((1, tile_bl), lambda i: (0, i)),
            pl.BlockSpec((1, tile_bl), lambda i: (0, i)),
            pl.BlockSpec((T, tile_bl), lambda i: (0, i)),
        ],
        out_specs=pl.BlockSpec((T, tile_bl), lambda i: (0, i)),
        compiler_params=pltpu.CompilerParams(dimension_semantics=("parallel",)),
    )(rho_p, scale_p, noise_p)

    # Rows of the returned table are indexed by (t*B + b)*L + l.
    return u_tm[:, :BLF].reshape(T * B * L, Km1)


# ---------------------------------------------------------------------------
# Kernel 2: logits = X @ [0|beta] + [0|random_effects]
# (the reference-category zero column is baked into the padded inputs,
#  so there is no in-kernel concatenate).
# ---------------------------------------------------------------------------
def logits_kernel(x_ref, beta_ref, re_ref, out_ref):
    out_ref[...] = (jnp.dot(x_ref[...], beta_ref[...],
                            preferred_element_type=jnp.float32)
                    + re_ref[...]).astype(out_ref.dtype)


def hier_forward(params, X, batter_ids, league_ids, season_ids, *, B, L, T, K):
    Km1 = K - 1
    n, n_fixed = X.shape

    u_rows = compute_random_effects(params["raw_rho"], params["raw_chol"],
                                    params["eps"], B=B, L=L, T=T, Km1=Km1)

    # Data-dependent row gathers stay in XLA.
    # TODO(synk): could be fused into the logits kernel with scalar prefetch,
    # kept in XLA for robustness.
    u_idx = (season_ids * B + batter_ids) * L + league_ids
    random_effects = jnp.take(u_rows, u_idx, axis=0)                     # (n, Km1)
    eps_idx = (batter_ids * L + league_ids) * T + season_ids
    eps_sample = jnp.take(params["eps"].reshape(B * L * T, Km1), eps_idx, axis=0)

    # Large row tiles; pad n up to a multiple of tile_n instead of asserting
    # divisibility.  Zero column folded into beta / random effects.
    tile_n = min(512, _round_up(n, 8))
    n_pad = _round_up(n, tile_n)
    X_p = jnp.pad(X, ((0, n_pad - n), (0, 0)))
    beta_p = jnp.pad(params["beta"], ((0, 0), (1, 0)))                   # (n_fixed, K)
    re_p = jnp.pad(random_effects, ((0, n_pad - n), (1, 0)))             # (n_pad, K)

    logits = pl.pallas_call(
        logits_kernel,
        out_shape=jax.ShapeDtypeStruct((n_pad, K), jnp.float32),
        grid=(n_pad // tile_n,),
        in_specs=[
            pl.BlockSpec((tile_n, n_fixed), lambda i: (i, 0)),
            pl.BlockSpec((n_fixed, K), lambda i: (0, 0)),
            pl.BlockSpec((tile_n, K), lambda i: (i, 0)),
        ],
        out_specs=pl.BlockSpec((tile_n, K), lambda i: (i, 0)),
        compiler_params=pltpu.CompilerParams(dimension_semantics=("parallel",)),
    )(X_p, beta_p, re_p)

    return logits[:n], eps_sample


# ---------------------------------------------------------------------------
# Pure-JAX reference (mirrors the torch code line by line) for validation.
# ---------------------------------------------------------------------------
def reference_forward(params, X, bi, li, si, *, B, L, T, K):
    hi = lax.Precision.HIGHEST
    rho = jnp.tanh(params["raw_rho"])
    chol = params["raw_chol"]
    eps = params["eps"]

    u_list = []
    eps_t = eps[:, :, 0, :]
    scaling = 1.0 / jnp.sqrt(1.0 - rho ** 2)
    noise = jnp.einsum("KLL,BLK->BLK", chol, eps_t, precision=hi)
    u_curr = scaling * noise
    u_list.append(u_curr)
    u_prev = u_curr
    for t in range(1, T):
        eps_t = eps[:, :, t, :]
        noise = jnp.einsum("kij,blk->blj", chol, eps_t, precision=hi)
        u_curr = rho * u_prev + noise
        u_list.append(u_curr)
        u_prev = u_curr
    u = jnp.stack(u_list, axis=2)

    fixed = jnp.dot(X, params["beta"], precision=hi)
    re = u[bi, li, si, :]
    lp = fixed + re
    logits = jnp.concatenate([jnp.zeros((lp.shape[0], 1), lp.dtype), lp], axis=1)
    eps_sample = eps[bi, li, si, :]
    return logits, eps_sample


if __name__ == "__main__":
    # Small, consistent shapes. NOTE: the torch forward requires L == K-1.
    n_fixed, B, L, T, K = 8, 4, 3, 5, 4
    Km1 = K - 1
    n = 16

    key = jax.random.PRNGKey(0)
    keys = jax.random.split(key, 8)
    params = {
        "beta": jax.random.normal(keys[0], (n_fixed, Km1), jnp.float32),
        "raw_rho": jax.random.normal(keys[1], (L, Km1), jnp.float32),
        "raw_chol": jnp.tril(jax.random.normal(keys[2], (Km1, L, L), jnp.float32)),
        "eps": jax.random.normal(keys[3], (B, L, T, Km1), jnp.float32),
    }
    X = jax.random.normal(keys[4], (n, n_fixed), jnp.float32)
    batter_ids = jax.random.randint(keys[5], (n,), 0, B, dtype=jnp.int32)
    league_ids = jax.random.randint(keys[6], (n,), 0, L, dtype=jnp.int32)
    season_ids = jax.random.randint(keys[7], (n,), 0, T, dtype=jnp.int32)

    fwd = functools.partial(hier_forward, B=B, L=L, T=T, K=K)
    logits, eps_sample = jax.jit(fwd)(params, X, batter_ids, league_ids, season_ids)
    jax.block_until_ready((logits, eps_sample))

    ref_logits, ref_eps = reference_forward(params, X, batter_ids, league_ids,
                                            season_ids, B=B, L=L, T=T, K=K)
    np.testing.assert_allclose(np.asarray(logits), np.asarray(ref_logits),
                               rtol=1e-3, atol=1e-3)
    np.testing.assert_allclose(np.asarray(eps_sample), np.asarray(ref_eps),
                               rtol=1e-5, atol=1e-5)
    print("KERNEL_OK")
</pallas_src>

<mosaic_0001>
module attributes {stable_mosaic.version = 11 : i64} {
  func.func @ar1_kernel(%arg0: i32, %arg1: memref<1x128xf32, #tpu.memory_space<vmem>>, %arg2: memref<1x128xf32, #tpu.memory_space<vmem>>, %arg3: memref<5x128xf32, #tpu.memory_space<vmem>>, %arg4: memref<5x128xf32, #tpu.memory_space<vmem>>) attributes {dimension_semantics = [#tpu.dimension_semantics<parallel>], iteration_bounds = array<i64: 1>, scalar_prefetch = 0 : i64, scratch_operands = 0 : i64, tpu.core_type = #tpu.core_type<tc>, window_params = [{transform_indices = @transform_0, window_bounds = array<i64: 1, 128>}, {transform_indices = @transform_1, window_bounds = array<i64: 1, 128>}, {transform_indices = @transform_2, window_bounds = array<i64: 5, 128>}, {transform_indices = @transform_3, window_bounds = array<i64: 5, 128>}]} {
    %c0 = arith.constant 0 : index
    %c0_0 = arith.constant 0 : index
    %0 = vector.load %arg1[%c0, %c0_0] : memref<1x128xf32, #tpu.memory_space<vmem>>, vector<1x128xf32>
    %c0_1 = arith.constant 0 : index
    %c0_2 = arith.constant 0 : index
    %1 = vector.load %arg2[%c0_1, %c0_2] : memref<1x128xf32, #tpu.memory_space<vmem>>, vector<1x128xf32>
    %c0_3 = arith.constant 0 : index
    %c0_4 = arith.constant 0 : index
    %2 = vector.load %arg3[%c0_3, %c0_4] : memref<5x128xf32, #tpu.memory_space<vmem>>, vector<1x128xf32>
    %3 = arith.mulf %1, %2 : vector<1x128xf32>
    %c0_5 = arith.constant 0 : index
    %c0_6 = arith.constant 0 : index
    %4 = vector.load %arg4[%c0_5, %c0_6] : memref<5x128xf32, #tpu.memory_space<vmem>>, vector<1x128xf32>
    tpu.vector_store %arg4[%c0_5, %c0_6], %3 {strides = array<i32>} : memref<5x128xf32, #tpu.memory_space<vmem>>, vector<1x128xf32>,
    %5 = arith.mulf %0, %3 : vector<1x128xf32>
    %c1 = arith.constant 1 : index
    %c0_7 = arith.constant 0 : index
    %6 = vector.load %arg3[%c1, %c0_7] : memref<5x128xf32, #tpu.memory_space<vmem>>, vector<1x128xf32>
    %7 = arith.addf %5, %6 : vector<1x128xf32>
    %c1_8 = arith.constant 1 : index
    %c0_9 = arith.constant 0 : index
    %8 = vector.load %arg4[%c1_8, %c0_9] : memref<5x128xf32, #tpu.memory_space<vmem>>, vector<1x128xf32>
    tpu.vector_store %arg4[%c1_8, %c0_9], %7 {strides = array<i32>} : memref<5x128xf32, #tpu.memory_space<vmem>>, vector<1x128xf32>,
    %9 = arith.mulf %0, %7 : vector<1x128xf32>
    %c2 = arith.constant 2 : index
    %c0_10 = arith.constant 0 : index
    %10 = vector.load %arg3[%c2, %c0_10] : memref<5x128xf32, #tpu.memory_space<vmem>>, vector<1x128xf32>
    %11 = arith.addf %9, %10 : vector<1x128xf32>
    %c2_11 = arith.constant 2 : index
    %c0_12 = arith.constant 0 : index
    %12 = vector.load %arg4[%c2_11, %c0_12] : memref<5x128xf32, #tpu.memory_space<vmem>>, vector<1x128xf32>
    tpu.vector_store %arg4[%c2_11, %c0_12], %11 {strides = array<i32>} : memref<5x128xf32, #tpu.memory_space<vmem>>, vector<1x128xf32>,
    %13 = arith.mulf %0, %11 : vector<1x128xf32>
    %c3 = arith.constant 3 : index
    %c0_13 = arith.constant 0 : index
    %14 = vector.load %arg3[%c3, %c0_13] : memref<5x128xf32, #tpu.memory_space<vmem>>, vector<1x128xf32>
    %15 = arith.addf %13, %14 : vector<1x128xf32>
    %c3_14 = arith.constant 3 : index
    %c0_15 = arith.constant 0 : index
    %16 = vector.load %arg4[%c3_14, %c0_15] : memref<5x128xf32, #tpu.memory_space<vmem>>, vector<1x128xf32>
    tpu.vector_store %arg4[%c3_14, %c0_15], %15 {strides = array<i32>} : memref<5x128xf32, #tpu.memory_space<vmem>>, vector<1x128xf32>,
    %17 = arith.mulf %0, %15 : vector<1x128xf32>
    %c4 = arith.constant 4 : index
    %c0_16 = arith.constant 0 : index
    %18 = vector.load %arg3[%c4, %c0_16] : memref<5x128xf32, #tpu.memory_space<vmem>>, vector<1x128xf32>
    %19 = arith.addf %17, %18 : vector<1x128xf32>
    %c4_17 = arith.constant 4 : index
    %c0_18 = arith.constant 0 : index
    %20 = vector.load %arg4[%c4_17, %c0_18] : memref<5x128xf32, #tpu.memory_space<vmem>>, vector<1x128xf32>
    tpu.vector_store %arg4[%c4_17, %c0_18], %19 {strides = array<i32>} : memref<5x128xf32, #tpu.memory_space<vmem>>, vector<1x128xf32>,
    return
  }
  func.func @transform_0(%arg0: i32) -> (i32, i32) {
    %c0_i32 = arith.constant 0 : i32
    %c0_i32_0 = arith.constant 0 : i32
    return %c0_i32, %arg0 : i32, i32
  }
  func.func @transform_1(%arg0: i32) -> (i32, i32) {
    %c0_i32 = arith.constant 0 : i32
    %c0_i32_0 = arith.constant 0 : i32
    return %c0_i32, %arg0 : i32, i32
  }
  func.func @transform_2(%arg0: i32) -> (i32, i32) {
    %c0_i32 = arith.constant 0 : i32
    %c0_i32_0 = arith.constant 0 : i32
    return %c0_i32, %arg0 : i32, i32
  }
  func.func @transform_3(%arg0: i32) -> (i32, i32) {
    %c0_i32 = arith.constant 0 : i32
    %c0_i32_0 = arith.constant 0 : i32
    return %c0_i32, %arg0 : i32, i32
  }
}

module attributes {stable_mosaic.version = 11 : i64} {
  func.func @logits_kernel(%arg0: i32, %arg1: memref<16x8xf32, #tpu.memory_space<vmem>>, %arg2: memref<8x4xf32, #tpu.memory_space<vmem>>, %arg3: memref<16x4xf32, #tpu.memory_space<vmem>>, %arg4: memref<16x4xf32, #tpu.memory_space<vmem>>) attributes {dimension_semantics = [#tpu.dimension_semantics<parallel>], iteration_bounds = array<i64: 1>, scalar_prefetch = 0 : i64, scratch_operands = 0 : i64, tpu.core_type = #tpu.core_type<tc>, window_params = [{transform_indices = @transform_0, window_bounds = array<i64: 16, 8>}, {pipeline_mode = #tpu.pipeline_mode<synchronous>, transform_indices = @transform_1, window_bounds = array<i64: 8, 4>}, {transform_indices = @transform_2, window_bounds = array<i64: 16, 4>}, {transform_indices = @transform_3, window_bounds = array<i64: 16, 4>}]} {
    %c0 = arith.constant 0 : index
    %c0_0 = arith.constant 0 : index
    %0 = vector.load %arg1[%c0, %c0_0] : memref<16x8xf32, #tpu.memory_space<vmem>>, vector<16x8xf32>
    %c0_1 = arith.constant 0 : index
    %c0_2 = arith.constant 0 : index
    %1 = vector.load %arg2[%c0_1, %c0_2] : memref<8x4xf32, #tpu.memory_space<vmem>>, vector<8x4xf32>
    %cst = arith.constant dense<0.000000e+00> : vector<16x4xf32>
    %2 = tpu.matmul %0, %1, %cst {dimension_numbers = #tpu.dot_dimension_numbers<[1], [0], [0], [1], [0, 0, 1, 1], [], []>} : vector<16x8xf32>, vector<8x4xf32>, vector<16x4xf32> -> vector<16x4xf32>
    %c0_3 = arith.constant 0 : index
    %c0_4 = arith.constant 0 : index
    %3 = vector.load %arg3[%c0_3, %c0_4] : memref<16x4xf32, #tpu.memory_space<vmem>>, vector<16x4xf32>
    %4 = arith.addf %2, %3 : vector<16x4xf32>
    %c0_5 = arith.constant 0 : index
    %c0_6 = arith.constant 0 : index
    %5 = vector.load %arg4[%c0_5, %c0_6] : memref<16x4xf32, #tpu.memory_space<vmem>>, vector<16x4xf32>
    tpu.vector_store %arg4[%c0_5, %c0_6], %4 {strides = array<i32>} : memref<16x4xf32, #tpu.memory_space<vmem>>, vector<16x4xf32>,
    return
  }
  func.func @transform_0(%arg0: i32) -> (i32, i32) {
    %c0_i32 = arith.constant 0 : i32
    %c0_i32_0 = arith.constant 0 : i32
    return %arg0, %c0_i32 : i32, i32
  }
  func.func @transform_1(%arg0: i32) -> (i32, i32) {
    %c0_i32 = arith.constant 0 : i32
    %c0_i32_0 = arith.constant 0 : i32
    %c0_i32_1 = arith.constant 0 : i32
    return %c0_i32, %c0_i32_0 : i32, i32
  }
  func.func @transform_2(%arg0: i32) -> (i32, i32) {
    %c0_i32 = arith.constant 0 : i32
    %c0_i32_0 = arith.constant 0 : i32
    return %arg0, %c0_i32 : i32, i32
  }
  func.func @transform_3(%arg0: i32) -> (i32, i32) {
    %c0_i32 = arith.constant 0 : i32
    %c0_i32_0 = arith.constant 0 : i32
    return %arg0, %c0_i32 : i32, i32
  }
}

</mosaic_0001>

<bundles_post_ra>
// kernel: hier_forward.3
= control target key start
LH: loop header
LB: loop body
LE: loop exit
PB: predicated region body
PF: predicated region fallthrough
CT: control target
= control target key end

     0   :  { %vm19_vm0 = vcmask 64512   ;;  %vm49_vm1 = vcmask 31744   ;;  %s100_s1 = inlined_call_operand.vmem [shape: f32[8,4], index: 1, kind: input, shape index: {}]   ;;  %s101_s0 = inlined_call_operand.vmem [shape: f32[16,8], index: 0, kind: input, shape index: {}]   ;;  %s102_s2 = inlined_call_operand.vmem [shape: f32[16,4], index: 2, kind: input, shape index: {}]   ;;  %s103_s3 = inlined_call_operand.vmem [shape: f32[16,4], index: 3, kind: output, shape index: {}]  }
   0x1   :  { %v16_v0 = vld [vmem:[%s100_s1] sm:$0xff]  ;;  %v15_v2 = vld [vmem:[%s101_s0 + $0x8] sm:$0xff] }
   0x2   :  { %v14_v1 = vld [vmem:[%s101_s0] sm:$0xff]  ;;  %41 = vmatpush.msra.mxu0 %v16_v0  ;;  %58 = vmatpush.msra.mxu1 %v16_v0  ;;  %v18_v4 = vld [vmem:[%s102_s2 + $0x8] sm:$0xff] }
   0x3   :  { %56 = vmatmul.msk.f32.vlgmr.msra.gmra.mxu0 %vm19_vm0, %v14_v1  ;;  %57 = vmatmul.msk.f32.vlgmr.msra.gmra.mxu1 %vm19_vm0, %v15_v2  ;;  %v17_v3 = vld [vmem:[%s102_s2] sm:$0xff] }
  0x80   :  { %v43_v5 = vpop.f32.mrf.mxu0  ;;  %v46_v6 = vpop.f32.mrf.mxu1 }
  0x81   :  { %v44_v7 = vadd.f32 %v43_v5, %v17_v3  ;;  %v47_v8 = vadd.f32 %v46_v6, %v18_v4 }
  0x83   :  { %50 = vst.msk [vmem:[%s103_s3] sm:$0xff] %vm49_vm1, %v44_v7 }
  0x84   :  { %51 = vst.msk [vmem:[%s103_s3 + $0x8] sm:$0xff] %vm49_vm1, %v47_v8 }

// kernel: hier_forward.2
= control target key start
LH: loop header
LB: loop body
LE: loop exit
PB: predicated region body
PF: predicated region fallthrough
CT: control target
= control target key end

     0   :  { %s95_s1 = inlined_call_operand.vmem [shape: f32[1,128], index: 1, kind: input, shape index: {}]   ;;  %s96_s2 = inlined_call_operand.vmem [shape: f32[5,128], index: 2, kind: input, shape index: {}]   ;;  %s97_s0 = inlined_call_operand.vmem [shape: f32[1,128], index: 0, kind: input, shape index: {}]   ;;  %s98_s3 = inlined_call_operand.vmem [shape: f32[5,128], index: 3, kind: output, shape index: {}]  }
   0x1   :  { %v15_v0 = vld [vmem:[%s95_s1] sm:$0x1]  ;;  %v20_v4 = vld [vmem:[%s96_s2 + $0x1] sm:$0x1]  ;;  %v24_v7 = vld [vmem:[%s96_s2 + $0x2] sm:$0x1] }
   0x2   :  { %v16_v1 = vld [vmem:[%s96_s2] sm:$0x1]  ;;  %v28_v10 = vld [vmem:[%s96_s2 + $0x3] sm:$0x1]  ;;  %v32_v13 = vld [vmem:[%s96_s2 + $0x4] sm:$0x1] }
   0x3   :  { %v14_v2 = vld [vmem:[%s97_s0] sm:$0x1]  ;;  %v17_v3 = vmul.f32 %v16_v1, %v15_v0 }
   0x5   :  { %18 = vst [vmem:[%s98_s3] sm:$0x1] %v17_v3  ;;  %v19_v5 = vmul.f32 %v17_v3, %v14_v2 }
   0x7   :  { %v21_v6 = vadd.f32 %v20_v4, %v19_v5 }
   0x9   :  { %22 = vst [vmem:[%s98_s3 + $0x1] sm:$0x1] %v21_v6  ;;  %v23_v8 = vmul.f32 %v21_v6, %v14_v2 }
   0xb   :  { %v25_v9 = vadd.f32 %v24_v7, %v23_v8 }
   0xd   :  { %26 = vst [vmem:[%s98_s3 + $0x2] sm:$0x1] %v25_v9  ;;  %v27_v11 = vmul.f32 %v25_v9, %v14_v2 }
   0xf   :  { %v29_v12 = vadd.f32 %v28_v10, %v27_v11 }
  0x11   :  { %30 = vst [vmem:[%s98_s3 + $0x3] sm:$0x1] %v29_v12  ;;  %v31_v14 = vmul.f32 %v29_v12, %v14_v2 }
  0x13   :  { %v33_v15 = vadd.f32 %v32_v13, %v31_v14 }
  0x15   :  { %34 = vst [vmem:[%s98_s3 + $0x4] sm:$0x1] %v33_v15 }

</bundles_post_ra>
